<compile_context>
chip_gen: v6e
topology: v6e:2x2x1
jax: 0.10.0
libtpu: 0.0.40
codegen_flags: <defaults>
</compile_context>

<pallas_src>
import functools
import math

import jax
import jax.numpy as jnp
from jax.experimental import pallas as pl
from jax.experimental.pallas import tpu as pltpu


LANE = 128
EPS = 1e-5
_MAX_PACK_WIDTH = 512             # max packed lane width (block-diag M <= 1 MiB f32)
_MAX_TILE_ROWS = 4096             # row-tile cap (v7x-friendly)
_VMEM_BUDGET = 24 * 1024 * 1024   # scratch budget used to size the row tile
_VMEM_LIMIT = 48 * 1024 * 1024    # < v7x 64 MiB physical; >> v5e 16 MiB default


def _round_up(a, b):
    return ((a + b - 1) // b) * b


def _ln_direct_kernel(x_ref, w_ref, b_ref, o_ref):
    # Direct path: stats over the lane (last) axis of a (tr, C) tile.
    x = x_ref[...].astype(jnp.float32)
    mu = jnp.mean(x, axis=-1, keepdims=True)
    xc = x - mu
    var = jnp.mean(xc * xc, axis=-1, keepdims=True)       # unbiased=False
    y = xc * jax.lax.rsqrt(var + EPS)
    o_ref[...] = (y * w_ref[...] + b_ref[...]).astype(o_ref.dtype)


def _ln_packed_kernel(x_ref, w_ref, b_ref, m_ref, o_ref, *, inv_c):
    # Lane-dense path: each W-lane row packs P = W // C original rows.
    #   x_ref: (tr, W);  m_ref: (W, W) f32 block-diagonal with exact 1.0 on
    #   each CxC diagonal block -> x @ m broadcasts each segment's sum back
    #   across its own C lanes (loads/stores stay lane-dense, unmasked vst).
    #   w_ref / b_ref: (1, W) f32 (weight / bias tiled P times).
    # precision=HIGHEST keeps the f32 sum MXU-accurate without any manual
    # hi/lo split temporaries (MXU has huge slack; the stream is HBM-bound).
    x = x_ref[...].astype(jnp.float32)
    m = m_ref[...]
    inv_c = jnp.float32(inv_c)

    s = jnp.dot(x, m, precision=jax.lax.Precision.HIGHEST,
                preferred_element_type=jnp.float32)
    mu = s * inv_c
    xc = x - mu
    sq = xc * xc
    s2 = jnp.dot(sq, m, precision=jax.lax.Precision.HIGHEST,
                 preferred_element_type=jnp.float32)
    var = s2 * inv_c

    y = xc * jax.lax.rsqrt(var + EPS)
    o_ref[...] = (y * w_ref[...] + b_ref[...]).astype(o_ref.dtype)


def withbias_layernorm(x, weight, bias):
    """LayerNorm over the last dim of x with affine weight & bias (eps=1e-5)."""
    orig_shape = x.shape
    C = orig_shape[-1]
    rows = math.prod(orig_shape[:-1])
    itemsize = jnp.dtype(x.dtype).itemsize
    sub = max(8, 32 // itemsize)                 # sublane multiple for x.dtype

    # Lane-dense packing: W = lcm(C, 128) lanes hold P = W // C original rows.
    W = (C * LANE) // math.gcd(C, LANE)
    P = W // C
    packed = (P > 1) and (W <= _MAX_PACK_WIDTH)

    if packed:
        lane_width = W
        total_rows = _round_up(rows, P) // P     # packed row count
        n_temps = 8                              # est. tile-sized f32 temps
    else:
        lane_width = C
        total_rows = rows
        n_temps = 5

    # ---- row-tile selection (mem-bound kernel -> as big as VMEM allows) ----
    bytes_per_row = lane_width * (4 * itemsize + 4 * n_temps)
    tr = max(sub, _VMEM_BUDGET // max(bytes_per_row, 1))
    tr = min(tr, _MAX_TILE_ROWS)
    tr = min(tr, _round_up(total_rows, sub))     # never bigger than the array
    # Megacore (v7x): prefer >= 8 grid steps so each TensorCore pipelines
    # several steps, but never shrink tiles below ~512 rows just to make steps.
    eight_way = _round_up(-(-total_rows // 8), sub)
    if eight_way >= 512:
        tr = min(tr, eight_way)
    tr = max(sub, (tr // sub) * sub)

    grid = (pl.cdiv(total_rows, tr),)

    cparams = pltpu.CompilerParams(
        dimension_semantics=("parallel",),
        vmem_limit_bytes=_VMEM_LIMIT,
    )

    x2 = x.reshape(rows, C)
    w32 = weight.astype(jnp.float32).reshape(1, C)
    b32 = bias.astype(jnp.float32).reshape(1, C)

    if packed:
        rows_p = total_rows * P
        if rows_p != rows:
            # Tiny pad (< P rows) so the lane-dense reshape is exact; the
            # old full-tensor pad-to-tile / slice round trip is gone.
            x2 = jnp.pad(x2, ((0, rows_p - rows), (0, 0)))
        xp = x2.reshape(total_rows, W)           # contiguous -> free reshape
        wp = jnp.tile(w32, (1, P))               # (1, W)
        bp = jnp.tile(b32, (1, P))
        seg = jnp.arange(W, dtype=jnp.int32) // C
        m = (seg[:, None] == seg[None, :]).astype(jnp.float32)   # exact 0/1

        out = pl.pallas_call(
            functools.partial(_ln_packed_kernel, inv_c=1.0 / C),
            out_shape=jax.ShapeDtypeStruct((total_rows, W), x.dtype),
            grid_spec=pltpu.PrefetchScalarGridSpec(
                num_scalar_prefetch=0,
                grid=grid,
                in_specs=[
                    pl.BlockSpec((tr, W), lambda i: (i, 0)),    # x (streamed)
                    pl.BlockSpec((1, W), lambda i: (0, 0)),     # weight
                    pl.BlockSpec((1, W), lambda i: (0, 0)),     # bias
                    pl.BlockSpec((W, W), lambda i: (0, 0)),     # block-diag M
                ],
                out_specs=pl.BlockSpec((tr, W), lambda i: (i, 0)),
            ),
            compiler_params=cparams,
        )(xp, wp, bp, m)
        out = out.reshape(rows_p, C)
        if rows_p != rows:
            out = out[:rows]
    else:
        out = pl.pallas_call(
            _ln_direct_kernel,
            out_shape=jax.ShapeDtypeStruct((rows, C), x.dtype),
            grid_spec=pltpu.PrefetchScalarGridSpec(
                num_scalar_prefetch=0,
                grid=grid,
                in_specs=[
                    pl.BlockSpec((tr, C), lambda i: (i, 0)),    # x (streamed)
                    pl.BlockSpec((1, C), lambda i: (0, 0)),     # weight
                    pl.BlockSpec((1, C), lambda i: (0, 0)),     # bias
                ],
                out_specs=pl.BlockSpec((tr, C), lambda i: (i, 0)),
            ),
            compiler_params=cparams,
        )(x2, w32, b32)

    return out.reshape(orig_shape)


def _reference(x, weight, bias):
    mu = jnp.mean(x, axis=-1, keepdims=True)
    var = jnp.mean((x - mu) ** 2, axis=-1, keepdims=True)
    return (x - mu) / jnp.sqrt(var + EPS) * weight + bias


if __name__ == "__main__":
    key = jax.random.PRNGKey(0)
    k0, k1, k2 = jax.random.split(key, 3)

    # --- main example: normalized_shape = 32, x: (batch=2, seq=64, hidden=32)
    # (lane-packed path: W=128, P=4)
    B, L, C = 2, 64, 32
    x = jax.random.normal(k0, (B, L, C), dtype=jnp.float32)
    weight = jnp.ones((C,), dtype=jnp.float32)   # nn.Parameter(torch.ones)
    bias = jnp.zeros((C,), dtype=jnp.float32)    # nn.Parameter(torch.zeros)

    out = jax.block_until_ready(withbias_layernorm(x, weight, bias))
    ref = _reference(x, weight, bias)
    assert out.shape == x.shape and out.dtype == x.dtype
    assert jnp.max(jnp.abs(out - ref)) < 2e-4

    # --- secondary: C = 256 exercises the direct (already lane-dense) path
    C2 = 256
    x2 = jax.random.normal(k1, (4, 8, C2), dtype=jnp.float32)
    w2 = jnp.ones((C2,), dtype=jnp.float32)
    b2 = jnp.zeros((C2,), dtype=jnp.float32)
    out2 = jax.block_until_ready(withbias_layernorm(x2, w2, b2))
    ref2 = _reference(x2, w2, b2)
    assert out2.shape == x2.shape
    assert jnp.max(jnp.abs(out2 - ref2)) < 2e-4

    # --- Restormer-like C = 48 exercises the generalized packing (W=384, P=8)
    # with a row count that needs the tiny pad-to-multiple-of-P path.
    C3 = 48
    x3 = jax.random.normal(k2, (2, 3, 5, C3), dtype=jnp.float32)
    w3 = jnp.ones((C3,), dtype=jnp.float32)
    b3 = jnp.zeros((C3,), dtype=jnp.float32)
    out3 = jax.block_until_ready(withbias_layernorm(x3, w3, b3))
    ref3 = _reference(x3, w3, b3)
    assert out3.shape == x3.shape
    assert jnp.max(jnp.abs(out3 - ref3)) < 2e-4

    print("KERNEL_OK")
</pallas_src>

<mosaic_0001>
module attributes {stable_mosaic.version = 11 : i64} {
  func.func @_ln_packed_kernel(%arg0: i32, %arg1: memref<32x128xf32, #tpu.memory_space<vmem>>, %arg2: memref<1x128xf32, #tpu.memory_space<vmem>>, %arg3: memref<1x128xf32, #tpu.memory_space<vmem>>, %arg4: memref<128x128xf32, #tpu.memory_space<vmem>>, %arg5: memref<32x128xf32, #tpu.memory_space<vmem>>) attributes {dimension_semantics = [#tpu.dimension_semantics<parallel>], iteration_bounds = array<i64: 1>, scalar_prefetch = 0 : i64, scratch_operands = 0 : i64, tpu.core_type = #tpu.core_type<tc>, window_params = [{transform_indices = @transform_0, window_bounds = array<i64: 32, 128>}, {pipeline_mode = #tpu.pipeline_mode<synchronous>, transform_indices = @transform_1, window_bounds = array<i64: 1, 128>}, {pipeline_mode = #tpu.pipeline_mode<synchronous>, transform_indices = @transform_2, window_bounds = array<i64: 1, 128>}, {pipeline_mode = #tpu.pipeline_mode<synchronous>, transform_indices = @transform_3, window_bounds = array<i64: 128, 128>}, {transform_indices = @transform_4, window_bounds = array<i64: 32, 128>}]} {
    %c0 = arith.constant 0 : index
    %c0_0 = arith.constant 0 : index
    %0 = vector.load %arg1[%c0, %c0_0] : memref<32x128xf32, #tpu.memory_space<vmem>>, vector<32x128xf32>
    %c0_1 = arith.constant 0 : index
    %c0_2 = arith.constant 0 : index
    %1 = vector.load %arg4[%c0_1, %c0_2] : memref<128x128xf32, #tpu.memory_space<vmem>>, vector<128x128xf32>
    %cst = arith.constant dense<0.000000e+00> : vector<32x128xf32>
    %2 = tpu.matmul %0, %1, %cst {dimension_numbers = #tpu.dot_dimension_numbers<[1], [0], [0], [1], [0, 0, 1, 1], [], []>, precision = #tpu.contract_precision<fp32>} : vector<32x128xf32>, vector<128x128xf32>, vector<32x128xf32> -> vector<32x128xf32>
    %cst_3 = arith.constant 3.125000e-02 : f32
    %3 = vector.broadcast %cst_3 : f32 to vector<32x128xf32>
    %4 = arith.mulf %2, %3 : vector<32x128xf32>
    %5 = arith.subf %0, %4 : vector<32x128xf32>
    %6 = arith.mulf %5, %5 : vector<32x128xf32>
    %cst_4 = arith.constant dense<0.000000e+00> : vector<32x128xf32>
    %7 = tpu.matmul %6, %1, %cst_4 {dimension_numbers = #tpu.dot_dimension_numbers<[1], [0], [0], [1], [0, 0, 1, 1], [], []>, precision = #tpu.contract_precision<fp32>} : vector<32x128xf32>, vector<128x128xf32>, vector<32x128xf32> -> vector<32x128xf32>
    %cst_5 = arith.constant 3.125000e-02 : f32
    %8 = vector.broadcast %cst_5 : f32 to vector<32x128xf32>
    %9 = arith.mulf %7, %8 : vector<32x128xf32>
    %cst_6 = arith.constant 9.99999974E-6 : f32
    %10 = vector.broadcast %cst_6 : f32 to vector<32x128xf32>
    %11 = arith.addf %9, %10 : vector<32x128xf32>
    %12 = math.rsqrt %11 : vector<32x128xf32>
    %13 = arith.mulf %5, %12 : vector<32x128xf32>
    %c0_7 = arith.constant 0 : index
    %c0_8 = arith.constant 0 : index
    %14 = vector.load %arg2[%c0_7, %c0_8] : memref<1x128xf32, #tpu.memory_space<vmem>>, vector<1x128xf32>
    %15 = vector.broadcast %14 : vector<1x128xf32> to vector<32x128xf32>
    %16 = arith.mulf %13, %15 : vector<32x128xf32>
    %c0_9 = arith.constant 0 : index
    %c0_10 = arith.constant 0 : index
    %17 = vector.load %arg3[%c0_9, %c0_10] : memref<1x128xf32, #tpu.memory_space<vmem>>, vector<1x128xf32>
    %18 = vector.broadcast %17 : vector<1x128xf32> to vector<32x128xf32>
    %19 = arith.addf %16, %18 : vector<32x128xf32>
    %c0_11 = arith.constant 0 : index
    %c0_12 = arith.constant 0 : index
    %20 = vector.load %arg5[%c0_11, %c0_12] : memref<32x128xf32, #tpu.memory_space<vmem>>, vector<32x128xf32>
    tpu.vector_store %arg5[%c0_11, %c0_12], %19 {strides = array<i32>} : memref<32x128xf32, #tpu.memory_space<vmem>>, vector<32x128xf32>,
    return
  }
  func.func @transform_0(%arg0: i32) -> (i32, i32) {
    %c0_i32 = arith.constant 0 : i32
    %c0_i32_0 = arith.constant 0 : i32
    return %arg0, %c0_i32 : i32, i32
  }
  func.func @transform_1(%arg0: i32) -> (i32, i32) {
    %c0_i32 = arith.constant 0 : i32
    %c0_i32_0 = arith.constant 0 : i32
    %c0_i32_1 = arith.constant 0 : i32
    return %c0_i32, %c0_i32_0 : i32, i32
  }
  func.func @transform_2(%arg0: i32) -> (i32, i32) {
    %c0_i32 = arith.constant 0 : i32
    %c0_i32_0 = arith.constant 0 : i32
    %c0_i32_1 = arith.constant 0 : i32
    return %c0_i32, %c0_i32_0 : i32, i32
  }
  func.func @transform_3(%arg0: i32) -> (i32, i32) {
    %c0_i32 = arith.constant 0 : i32
    %c0_i32_0 = arith.constant 0 : i32
    %c0_i32_1 = arith.constant 0 : i32
    return %c0_i32, %c0_i32_0 : i32, i32
  }
  func.func @transform_4(%arg0: i32) -> (i32, i32) {
    %c0_i32 = arith.constant 0 : i32
    %c0_i32_0 = arith.constant 0 : i32
    return %arg0, %c0_i32 : i32, i32
  }
}

</mosaic_0001>

<bundles_post_ra>
// kernel: tpu_custom_call.1
= control target key start
LH: loop header
LB: loop body
LE: loop exit
PB: predicated region body
PF: predicated region fallthrough
CT: control target
= control target key end

     0   :  { %9 = vsyncpa [#allocation3], 0  ;;  %s3236_s0 = inlined_call_operand.hbm [shape: f32[32,128], index: 0, kind: input, shape index: {}]   ;;  %s3237_s1 = inlined_call_operand.vmem [shape: f32[1,128], index: 1, kind: input, shape index: {}]   ;;  %s3238_s2 = inlined_call_operand.vmem [shape: f32[1,128], index: 2, kind: input, shape index: {}]   ;;  %s3239_s3 = inlined_call_operand.hbm [shape: f32[128,128], index: 3, kind: input, shape index: {}]   ;;  %s3240_s4 = inlined_call_operand.hbm [shape: f32[32,128], index: 4, kind: output, shape index: {}]  }
   0x1   :  { %10 = vsyncpa [#allocation6], 0 }
   0x2   :  { %11 = vsyncpa [#allocation4], 0  ;;  %s2455_s15 = smov [#allocation2]  }
   0x3   :  { %s17_s16 = sshll.u32 %s2455_s15, 4  ;;  %s18_s16 = int_to_ptr.vmem [resolvable:$true] %s17_s16 }
   0x4   :  { %s2397_s17 = scalar_lea.vmem %s18_s16, 512  ;;  %p2402_p1 = scmp.lt.s32.totalorder %s18_s16, %s18_s16 }
   0x5   :  { %p2398_p0 = scmp.ne.s32.totalorder %s18_s16, %s2397_s17  ;;  %p2403_p2 = scmp.lt.s32.totalorder %s2397_s17, %s2397_s17 }
   0x7   :  { %p2404_p3 = por %p2403_p2, %p2402_p1 }
   0x9   :  { %p2405_p4 = pnand %p2404_p3, %p2398_p0 }
   0xb   :  { %2408 = shalt.err (!%p2405_p4)
}
   0xc   :  { %s2456_s18 = smov 128   ;;  %s2457_s19 = smov 8  }
   0xd   :  { %23 = dma.hbm_to_vmem [thread:$0]  %s3236_s0, 512, %s18_s16, [#allocation3], %s2456_s18, %s2456_s18, %s2457_s19  }
   0xe   :  { %s2458_s22 = smov [#allocation5]  }
   0xf   :  { %s33_s23 = sshll.u32 %s2458_s22, 4  ;;  %s34_s23 = int_to_ptr.vmem [resolvable:$true] %s33_s23 }
  0x10   :  { %s2417_s24 = scalar_lea.vmem %s34_s23, 2048  ;;  %p2422_p6 = scmp.lt.s32.totalorder %s34_s23, %s34_s23 }
  0x11   :  { %p2418_p5 = scmp.ne.s32.totalorder %s34_s23, %s2417_s24  ;;  %p2423_p7 = scmp.lt.s32.totalorder %s2417_s24, %s2417_s24 }
  0x13   :  { %p2424_p8 = por %p2423_p7, %p2422_p6 }
  0x15   :  { %p2425_p9 = pnand %p2424_p8, %p2418_p5 }
  0x17   :  { %2428 = shalt.err (!%p2425_p9)
}
  0x18   :  { %39 = dma.hbm_to_vmem [thread:$0]  %s3239_s3, 2048, %s34_s23, [#allocation6], %s2456_s18, %s2456_s18, %s2457_s19  }
  0x19   :  { %2449 = dma.done.wait [#allocation3], 512  }
  0x1a   :  { %2450 = vsyncadd [#allocation3], 4294966784 }
  0x1b   :  { %2451 = dma.done.wait [#allocation6], 2048  }
  0x1c   :  { %2452 = vsyncadd [#allocation6], 4294965248  ;;  %v65_v0 = vld [vmem:[#allocation5 + $0x78] sm:$0xff]  ;;  %v64_v1 = vld [vmem:[#allocation5 + $0x70] sm:$0xff] }
  0x1d   :  { %v63_v2 = vld [vmem:[#allocation5 + $0x68] sm:$0xff]  ;;  %v2497_v3 = vand.u32 4294901760, %v65_v0  ;;  %v2499_v4 = vand.u32 4294901760, %v64_v1  ;;  %v62_v6 = vld [vmem:[#allocation5 + $0x60] sm:$0xff]  ;;  %v61_v7 = vld [vmem:[#allocation5 + $0x58] sm:$0xff] }
  0x1e   :  { %v2501_v5 = vand.u32 4294901760, %v63_v2  ;;  %v60_v8 = vld [vmem:[#allocation5 + $0x50] sm:$0xff]  ;;  %v2503_v9 = vand.u32 4294901760, %v62_v6  ;;  %v2505_v10 = vand.u32 4294901760, %v61_v7  ;;  %v59_v12 = vld [vmem:[#allocation5 + $0x48] sm:$0xff]  ;;  %v58_v13 = vld [vmem:[#allocation5 + $0x40] sm:$0xff] }
  0x1f   :  { %v2507_v11 = vand.u32 4294901760, %v60_v8  ;;  %1920 = vmatprep.subr.mxu0 %v2497_v3  ;;  %v2511_v14 = vsub.f32 %v65_v0, %v2497_v3  ;;  %v2514_v15 = vsub.f32 %v64_v1, %v2499_v4  ;;  %v2516_v16 = vand.u32 4294901760, %v59_v12  ;;  %v57_v18 = vld [vmem:[#allocation5 + $0x38] sm:$0xff]  ;;  %v56_v25 = vld [vmem:[#allocation5 + $0x30] sm:$0xff]  ;;  %v55_v35 = vld [vmem:[#allocation5 + $0x28] sm:$0xff] }
  0x20   :  { %v2519_v17 = vsub.f32 %v63_v2, %v2501_v5  ;;  %1921 = vmatpush3.msra.mxu0 %v2497_v3  ;;  %v2523_v19 = vsub.f32 %v62_v6, %v2503_v9  ;;  %v2526_v20 = vsub.f32 %v61_v7, %v2505_v10  ;;  %v2538_v24 = vand.u32 4294901760, %v58_v13  ;;  %v54_v40 = vld [vmem:[#allocation5 + $0x20] sm:$0xff]  ;;  %v53_v48 = vld [vmem:[#allocation5 + $0x18] sm:$0xff]  ;;  %v2611_v54 = vld [vmem:[#allocation2 + $0x8] sm:$0xff] }
  0x21   :  { %1922 = vmatprep.subr.mxu0 %v2499_v4  ;;  %v2530_v21 = vand.u32 4294901760, %v2511_v14  ;;  %v2533_v22 = vand.u32 4294901760, %v2514_v15  ;;  %v2544_v27 = vand.u32 4294901760, %v57_v18  ;;  %v2550_v29 = vsub.f32 %v60_v8, %v2507_v11  ;;  %v2597_v49 = vld [vmem:[#allocation2] sm:$0xff]  ;;  %3324 = vst [vmem:[#allocation29_spill] sm:$0xff] %v2611_v54  ;;  %v52_v59 = vld [vmem:[#allocation5 + $0x10] sm:$0xff] }
  0x22   :  { %3306 = vst [vmem:[#allocation11_spill] sm:$0xff] %v2523_v19  ;;  %3307 = vst [vmem:[#allocation12_spill] sm:$0xff] %v2526_v20  ;;  %v2536_v23 = vand.u32 4294901760, %v2519_v17  ;;  %1923 = vmatpush3.msra.mxu0 %v2499_v4  ;;  %v2542_v26 = vand.u32 4294901760, %v2523_v19  ;;  %v2547_v28 = vand.u32 4294901760, %v2526_v20  ;;  %v2560_v33 = vsub.f32 %v59_v12, %v2516_v16  ;;  %v51_v2 = vld [vmem:[#allocation5 + $0x8] sm:$0xff] }
  0x23   :  { %3308 = vst [vmem:[#allocation13_spill] sm:$0xff] %v2530_v21  ;;  %3309 = vst [vmem:[#allocation14_spill] sm:$0xff] %v2533_v22  ;;  %1924 = vmatprep.subr.mxu0 %v2501_v5  ;;  %v191_v30 = vsub.f32 %v2511_v14, %v2530_v21  ;;  %v198_v31 = vsub.f32 %v2514_v15, %v2533_v22  ;;  %v2563_v34 = vand.u32 4294901760, %v56_v25  ;;  %v2573_v39 = vand.u32 4294901760, %v2550_v29 }
  0x24   :  { %3310 = vst [vmem:[#allocation15_spill] sm:$0xff] %v2536_v23  ;;  %3311 = vst [vmem:[#allocation16_spill] sm:$0xff] %v2542_v26  ;;  %v205_v32 = vsub.f32 %v2519_v17, %v2536_v23  ;;  %1925 = vmatpush3.msra.mxu0 %v2501_v5  ;;  %v212_v38 = vsub.f32 %v2523_v19, %v2542_v26  ;;  %v219_v41 = vsub.f32 %v2526_v20, %v2547_v28 }
  0x25   :  { %3312 = vst [vmem:[#allocation17_spill] sm:$0xff] %v2547_v28  ;;  %3313 = vst [vmem:[#allocation18_spill] sm:$0xff] %v2550_v29  ;;  %1926 = vmatprep.subr.mxu0 %v2503_v9  ;;  %v2566_v36 = vand.u32 4294901760, %v191_v30  ;;  %v2568_v37 = vand.u32 4294901760, %v198_v31  ;;  %v2579_v42 = vand.u32 4294901760, %v2560_v33  ;;  %v2582_v43 = vsub.f32 %v58_v13, %v2538_v24 }
  0x26   :  { %3315 = vst [vmem:[#allocation20_spill] sm:$0xff] %v2573_v39  ;;  %1927 = vmatpush3.msra.mxu0 %v2503_v9  ;;  %v2586_v44 = vand.u32 4294901760, %v205_v32  ;;  %v2588_v45 = vand.u32 4294901760, %v55_v35  ;;  %v2591_v46 = vsub.f32 %v57_v18, %v2544_v27  ;;  %v2595_v47 = vand.u32 4294901760, %v54_v40  ;;  %3320 = vst [vmem:[#allocation25_spill] sm:$0xff] %v2597_v49  ;;  %v50_v18 = vld [vmem:[#allocation5] sm:$0xff] }
  0x27   :  { %3314 = vst [vmem:[#allocation19_spill] sm:$0xff] %v2568_v37  ;;  %3316 = vst [vmem:[#allocation21_spill] sm:$0xff] %v2579_v42  ;;  %1928 = vmatprep.subr.mxu0 %v2505_v10  ;;  %1958 = vmatprep.subr.mxu1 %v2566_v36  ;;  %v2601_v50 = vand.u32 4294901760, %v212_v38  ;;  %v226_v51 = vsub.f32 %v2550_v29, %v2573_v39  ;;  %v2606_v52 = vand.u32 4294901760, %v2582_v43  ;;  %v2615_v55 = vand.u32 4294901760, %v219_v41 }
  0x28   :  { %3317 = vst [vmem:[#allocation22_spill] sm:$0xff] %v2582_v43  ;;  %3318 = vst [vmem:[#allocation23_spill] sm:$0xff] %v2586_v44  ;;  %1929 = vmatpush3.msra.mxu0 %v2505_v10  ;;  %1959 = vmatpush3.msra.mxu1 %v2566_v36  ;;  %v2609_v53 = vsub.f32 %v56_v25, %v2563_v34  ;;  %v233_v56 = vsub.f32 %v2560_v33, %v2579_v42  ;;  %v2621_v57 = vand.u32 4294901760, %v53_v48 }
  0x29   :  { %3319 = vst [vmem:[#allocation24_spill] sm:$0xff] %v2591_v46  ;;  %1930 = vmatprep.subr.mxu0 %v2507_v11  ;;  %1960 = vmatprep.subr.mxu1 %v2568_v37  ;;  %3321 = vst [vmem:[#allocation26_spill] sm:$0xff] %v2601_v50  ;;  %v2624_v58 = vand.u32 4294901760, %v2591_v46  ;;  %v2627_v60 = vsub.f32 %v55_v35, %v2588_v45  ;;  %v2630_v61 = vand.u32 4294901760, %v2597_v49  ;;  %v2635_v62 = vand.u32 4294901760, %v2611_v54 }
  0x2a   :  { %3322 = vst [vmem:[#allocation27_spill] sm:$0xff] %v2606_v52  ;;  %3323 = vst [vmem:[#allocation28_spill] sm:$0xff] %v2609_v53  ;;  %1931 = vmatpush3.msra.mxu0 %v2507_v11  ;;  %1961 = vmatpush3.msra.mxu1 %v2568_v37  ;;  %v2639_v63 = vand.u32 4294901760, %v226_v51  ;;  %v240_v0 = vsub.f32 %v2582_v43, %v2606_v52  ;;  %v2644_v1 = vand.u32 4294901760, %v2609_v53  ;;  %v2651_v7 = vand.u32 4294901760, %v233_v56 }
  0x2b   :  { %3325 = vst [vmem:[#allocation30_spill] sm:$0xff] %v2615_v55  ;;  %1932 = vmatprep.subr.mxu0 %v2516_v16  ;;  %1962 = vmatprep.subr.mxu1 %v2586_v44  ;;  %3326 = vst [vmem:[#allocation31_spill] sm:$0xff] %v2624_v58  ;;  %v2647_v6 = vsub.f32 %v54_v40, %v2595_v47  ;;  %v2653_v8 = vand.u32 4294901760, %v52_v59  ;;  %v247_v12 = vsub.f32 %v2591_v46, %v2624_v58 }
  0x2c   :  { %1933 = vmatpush3.msra.mxu0 %v2516_v16  ;;  %1963 = vmatpush3.msra.mxu1 %v2586_v44  ;;  %3327 = vst [vmem:[#allocation32_spill] sm:$0xff] %v2639_v63  ;;  %3328 = vst [vmem:[#allocation33_spill] sm:$0xff] %v2644_v1  ;;  %v2660_v13 = vand.u32 4294901760, %v2627_v60  ;;  %v2664_v25 = vsub.f32 %v2597_v49, %v2630_v61  ;;  %v2667_v30 = vsub.f32 %v53_v48, %v2621_v57 }
  0x2d   :  { %1934 = vmatprep.subr.mxu0 %v2538_v24  ;;  %1964 = vmatprep.subr.mxu1 %v2601_v50  ;;  %3329 = vst [vmem:[#allocation34_spill] sm:$0xff] %v2651_v7  ;;  %v2671_v31 = vand.u32 4294901760, %v51_v2  ;;  %v2675_v32 = vsub.f32 %v2611_v54, %v2635_v62  ;;  %v2679_v35 = vand.u32 4294901760, %v240_v0  ;;  %v254_v38 = vsub.f32 %v2609_v53, %v2644_v1 }
  0x2e   :  { %1935 = vmatpush3.msra.mxu0 %v2538_v24  ;;  %1965 = vmatpush3.msra.mxu1 %v2601_v50  ;;  %3330 = vst [vmem:[#allocation35_spill] sm:$0xff] %v2660_v13  ;;  %v2684_v40 = vand.u32 4294901760, %v2647_v6  ;;  %v2688_v41 = vand.u32 4294901760, %v50_v18  ;;  %v2691_v48 = vsub.f32 %v52_v59, %v2653_v8  ;;  %v2695_v51 = vand.u32 4294901760, %v247_v12 }
  0x2f   :  { %1936 = vmatprep.subr.mxu0 %v2544_v27  ;;  %1966 = vmatprep.subr.mxu1 %v2615_v55  ;;  %3331 = vst [vmem:[#allocation36_spill] sm:$0xff] %v2679_v35  ;;  %v261_v56 = vsub.f32 %v2627_v60, %v2660_v13  ;;  %v2701_v49 = vand.u32 4294901760, %v2667_v30  ;;  %v2707_v54 = vsub.f32 %v51_v2, %v2671_v31  ;;  %v2711_v12 = vand.u32 4294901760, %v254_v38 }
  0x30   :  { %1937 = vmatpush3.msra.mxu0 %v2544_v27  ;;  %1967 = vmatpush3.msra.mxu1 %v2615_v55  ;;  %3332 = vst [vmem:[#allocation37_spill] sm:$0xff] %v2684_v40  ;;  %3333 = vst [vmem:[#allocation38_spill] sm:$0xff] %v2695_v51  ;;  %v268_v0 = vsub.f32 %v2647_v6, %v2684_v40  ;;  %v2721_v59 = vsub.f32 %v50_v18, %v2688_v41  ;;  %v3337_v38 = vand.u32 4294901760, %v2664_v25 }
  0x31   :  { %1938 = vmatprep.subr.mxu0 %v2563_v34  ;;  %1968 = vmatprep.subr.mxu1 %v2639_v63  ;;  %3334 = vst [vmem:[#allocation39_spill] sm:$0xff] %v2701_v49  ;;  %3335 = vst [vmem:[#allocation40_spill] sm:$0xff] %v2711_v12  ;;  %v2725_v2 = vand.u32 4294901760, %v261_v56  ;;  %v275_v55 = vsub.f32 %v2667_v30, %v2701_v49  ;;  %v3338_v18 = vand.u32 4294901760, %v2675_v32  ;;  %v2738_v50 = vand.u32 4294901760, %v2707_v54 }
  0x32   :  { %1939 = vmatpush3.msra.mxu0 %v2563_v34  ;;  %1969 = vmatpush3.msra.mxu1 %v2639_v63  ;;  %v150_v63 = vsub.f32 %v2664_v25, %v3337_v38  ;;  %v2742_v56 = vand.u32 4294901760, %v268_v0 }
  0x33   :  { %1940 = vmatprep.subr.mxu0 %v2588_v45  ;;  %1970 = vmatprep.subr.mxu1 %v2651_v7  ;;  %3339 = vst [vmem:[#allocation42_spill] sm:$0xff] %v2738_v50  ;;  %v2753_v44 = vand.u32 4294901760, %v275_v55 }
  0x34   :  { %1941 = vmatpush3.msra.mxu0 %v2588_v45  ;;  %1971 = vmatpush3.msra.mxu1 %v2651_v7  ;;  %v2718_v7 = vand.u32 4294901760, %v2691_v48 }
  0x35   :  { %1942 = vmatprep.subr.mxu0 %v2595_v47  ;;  %1972 = vmatprep.subr.mxu1 %v2679_v35 }
  0x36   :  { %1943 = vmatpush3.msra.mxu0 %v2595_v47  ;;  %1973 = vmatpush3.msra.mxu1 %v2679_v35  ;;  %3336 = vst [vmem:[#allocation41_spill] sm:$0xff] %v2718_v7  ;;  %v160_v35 = vsub.f32 %v2675_v32, %v3338_v18  ;;  %v282_v38 = vsub.f32 %v2691_v48, %v2718_v7  ;;  %v151_v18 = vand.u32 4294901760, %v150_v63 }
  0x37   :  { %1944 = vmatprep.subr.mxu0 %v2621_v57  ;;  %1974 = vmatprep.subr.mxu1 %v2695_v51 }
  0x38   :  { %1945 = vmatpush3.msra.mxu0 %v2621_v57  ;;  %1975 = vmatpush3.msra.mxu1 %v2695_v51  ;;  %v2749_v51 = vand.u32 4294901760, %v2721_v59  ;;  %v161_v0 = vand.u32 4294901760, %v160_v35  ;;  %v2763_v37 = vand.u32 4294901760, %v282_v38  ;;  %v2787_v38 = vld [vmem:[#allocation2 + $0x18] sm:$0xff] }
  0x39   :  { %1946 = vmatprep.subr.mxu0 %v2653_v8  ;;  %1976 = vmatprep.subr.mxu1 %v2711_v12 }
  0x3a   :  { %1947 = vmatpush3.msra.mxu0 %v2653_v8  ;;  %1977 = vmatpush3.msra.mxu1 %v2711_v12  ;;  %3340 = vst [vmem:[#allocation43_spill] sm:$0xff] %v2749_v51  ;;  %v289_v12 = vsub.f32 %v2707_v54, %v2738_v50  ;;  %v296_v55 = vsub.f32 %v2721_v59, %v2749_v51 }
  0x3b   :  { %1948 = vmatprep.subr.mxu0 %v2671_v31  ;;  %1978 = vmatprep.subr.mxu1 %v2725_v2 }
  0x3c   :  { %1949 = vmatpush3.msra.mxu0 %v2671_v31  ;;  %1979 = vmatpush3.msra.mxu1 %v2725_v2  ;;  %v2769_v63 = vand.u32 4294901760, %v289_v12  ;;  %v2775_v35 = vand.u32 4294901760, %v296_v55  ;;  %v2783_v12 = vld [vmem:[#allocation2 + $0x10] sm:$0xff] }
  0x3d   :  { %1950 = vmatprep.subr.mxu0 %v2688_v41  ;;  %1980 = vmatprep.subr.mxu1 %v2742_v56 }
  0x3e   :  { %1951 = vmatpush3.msra.mxu0 %v2688_v41  ;;  %1981 = vmatpush3.msra.mxu1 %v2742_v56 }
  0x3f   :  { %1952 = vmatprep.mubr.f32.mxu0 %v151_v18  ;;  %1982 = vmatprep.subr.mxu1 %v2753_v44  ;;  %v2794_v18 = vand.u32 4294901760, %v2783_v12 }
  0x40   :  { %1996 = vmatprep.subr.mxu0 %v2511_v14  ;;  %1953 = vmatmul.mubr.f32.vlgmr.msra.gmra.mxu0 %v161_v0  ;;  %v2799_v0 = vand.u32 4294901760, %v2787_v38 }
  0x41   :  { %1983 = vmatpush3.msra.mxu1 %v2753_v44  ;;  %1997 = vmatpush3.msra.mxu0 %v2511_v14  ;;  %v2809_v55 = vsub.f32 %v2783_v12, %v2794_v18 }
  0x42   :  { %1984 = vmatprep.subr.mxu1 %v2763_v37  ;;  %1998 = vmatprep.subr.mxu0 %v2514_v15 }
  0x43   :  { %1985 = vmatpush3.msra.mxu1 %v2763_v37  ;;  %1999 = vmatpush3.msra.mxu0 %v2514_v15 }
  0x44   :  { %1986 = vmatprep.subr.mxu1 %v2769_v63  ;;  %2000 = vmatprep.subr.mxu0 %v2519_v17 }
  0x45   :  { %1987 = vmatpush3.msra.mxu1 %v2769_v63  ;;  %2001 = vmatpush3.msra.mxu0 %v2519_v17 }
  0x46   :  { %1988 = vmatprep.subr.mxu1 %v2775_v35  ;;  %2002 = vmatprep.subr.mxu0 %v2523_v19 }
  0x47   :  { %1989 = vmatpush3.msra.mxu1 %v2775_v35  ;;  %1990 = vmatprep.mubr.f32.mxu1 %v2630_v61 }
  0x48   :  { %2003 = vmatpush3.msra.mxu0 %v2523_v19  ;;  %1991 = vmatmul.mubr.f32.vlgmr.msra.gmra.mxu1 %v2635_v62 }
  0x49   :  { %2004 = vmatprep.subr.mxu0 %v2526_v20  ;;  %2034 = vmatprep.subr.mxu1 %v2497_v3 }
  0x4a   :  { %2005 = vmatpush3.msra.mxu0 %v2526_v20  ;;  %2035 = vmatpush3.msra.mxu1 %v2497_v3  ;;  %v2815_v20 = vsub.f32 %v2787_v38, %v2799_v0 }
  0x4b   :  { %2006 = vmatprep.subr.mxu0 %v2550_v29  ;;  %2036 = vmatprep.subr.mxu1 %v2499_v4 }
  0x4c   :  { %2007 = vmatpush3.msra.mxu0 %v2550_v29  ;;  %2037 = vmatpush3.msra.mxu1 %v2499_v4  ;;  %v3271_v29 = vand.u32 4294901760, %v2809_v55  ;;  %v179_v19 = vand.u32 4294901760, %v2815_v20 }
  0x4d   :  { %2008 = vmatprep.subr.mxu0 %v2560_v33  ;;  %2038 = vmatprep.subr.mxu1 %v2501_v5 }
  0x4e   :  { %2009 = vmatpush3.msra.mxu0 %v2560_v33  ;;  %2039 = vmatpush3.msra.mxu1 %v2501_v5 }
  0x4f   :  { %2010 = vmatprep.subr.mxu0 %v2582_v43  ;;  %2040 = vmatprep.subr.mxu1 %v2503_v9 }
  0x50   :  { %2011 = vmatpush3.msra.mxu0 %v2582_v43  ;;  %2041 = vmatpush3.msra.mxu1 %v2503_v9  ;;  %v170_v43 = vsub.f32 %v2809_v55, %v3271_v29 }
  0x51   :  { %2012 = vmatprep.subr.mxu0 %v2591_v46  ;;  %2042 = vmatprep.subr.mxu1 %v2505_v10 }
  0x52   :  { %2013 = vmatpush3.msra.mxu0 %v2591_v46  ;;  %2043 = vmatpush3.msra.mxu1 %v2505_v10  ;;  %v180_v46 = vsub.f32 %v2815_v20, %v179_v19  ;;  %v171_v29 = vand.u32 4294901760, %v170_v43  ;;  %v3342_v43 = vand.u32 4294901760, %v2675_v32 }
  0x53   :  { %2014 = vmatprep.subr.mxu0 %v2609_v53  ;;  %2044 = vmatprep.subr.mxu1 %v2507_v11 }
  0x54   :  { %2015 = vmatpush3.msra.mxu0 %v2609_v53  ;;  %2045 = vmatpush3.msra.mxu1 %v2507_v11  ;;  %v181_v53 = vand.u32 4294901760, %v180_v46  ;;  %v3343_v46 = vand.u32 4294901760, %v2809_v55 }
  0x55   :  { %2016 = vmatprep.subr.mxu0 %v2627_v60  ;;  %2046 = vmatprep.subr.mxu1 %v2516_v16 }
  0x56   :  { %2017 = vmatpush3.msra.mxu0 %v2627_v60  ;;  %2047 = vmatpush3.msra.mxu1 %v2516_v16 }
  0x57   :  { %2018 = vmatprep.subr.mxu0 %v2647_v6  ;;  %2048 = vmatprep.subr.mxu1 %v2538_v24 }
  0x58   :  { %2019 = vmatpush3.msra.mxu0 %v2647_v6  ;;  %2049 = vmatpush3.msra.mxu1 %v2538_v24 }
  0x59   :  { %2020 = vmatprep.subr.mxu0 %v2667_v30  ;;  %2050 = vmatprep.subr.mxu1 %v2544_v27 }
  0x5a   :  { %2021 = vmatpush3.msra.mxu0 %v2667_v30  ;;  %2051 = vmatpush3.msra.mxu1 %v2544_v27 }
  0x5b   :  { %2022 = vmatprep.subr.mxu0 %v2691_v48  ;;  %2052 = vmatprep.subr.mxu1 %v2563_v34 }
  0x5c   :  { %1955 = vmatprep.mubr.f32.mxu0 %v171_v29  ;;  %2023 = vmatpush3.msra.mxu0 %v2691_v48  ;;  %v3341_v29 = vand.u32 4294901760, %v2664_v25 }
  0x5d   :  { %2053 = vmatpush3.msra.mxu1 %v2563_v34  ;;  %1956 = vmatmul.mubr.f32.gmra.mxu0 %v181_v53  ;;  %v3346_v53 = vld [vmem:[#allocation26_spill] sm:$0xff] }
  0x5e   :  { %2024 = vmatprep.subr.mxu0 %v2707_v54  ;;  %2054 = vmatprep.subr.mxu1 %v2588_v45 }
  0x5f   :  { %2025 = vmatpush3.msra.mxu0 %v2707_v54  ;;  %2055 = vmatpush3.msra.mxu1 %v2588_v45 }
  0x60   :  { %2026 = vmatprep.subr.mxu0 %v2721_v59  ;;  %2056 = vmatprep.subr.mxu1 %v2595_v47 }
  0x61   :  { %2027 = vmatpush3.msra.mxu0 %v2721_v59  ;;  %2028 = vmatprep.mubr.f32.mxu0 %v2664_v25  ;;  %v3350_v25 = vld [vmem:[#allocation36_spill] sm:$0xff] }
  0x62   :  { %2057 = vmatpush3.msra.mxu1 %v2595_v47  ;;  %1993 = vmatprep.mubr.f32.mxu1 %v2794_v18 }
  0x63   :  { %2029 = vmatmul.mubr.f32.vlgmr.msra.gmra.mxu0 %v2675_v32  ;;  %2058 = vmatprep.subr.mxu1 %v2621_v57  ;;  %v3351_v32 = vld [vmem:[#allocation38_spill] sm:$0xff] }
  0x64   :  { %2072 = vmatprep.subr.mxu0 %v2530_v21  ;;  %1994 = vmatmul.mubr.f32.gmra.mxu1 %v2799_v0 }
  0x65   :  { %2059 = vmatpush3.msra.mxu1 %v2621_v57  ;;  %2073 = vmatpush3.msra.mxu0 %v2530_v21 }
  0x66   :  { %2060 = vmatprep.subr.mxu1 %v2653_v8  ;;  %2074 = vmatprep.subr.mxu0 %v2533_v22 }
  0x67   :  { %2031 = vmatprep.mubr.f32.mxu0 %v2809_v55  ;;  %2061 = vmatpush3.msra.mxu1 %v2653_v8 }
  0x68   :  { %2075 = vmatpush3.msra.mxu0 %v2533_v22  ;;  %2062 = vmatprep.subr.mxu1 %v2671_v31 }
  0x69   :  { %2032 = vmatmul.mubr.f32.gmra.mxu0 %v2815_v20  ;;  %2076 = vmatprep.subr.mxu0 %v2536_v23  ;;  %v3345_v20 = vld [vmem:[#allocation23_spill] sm:$0xff] }
  0x6a   :  { %2063 = vmatpush3.msra.mxu1 %v2671_v31  ;;  %2077 = vmatpush3.msra.mxu0 %v2536_v23 }
  0x6b   :  { %2064 = vmatprep.subr.mxu1 %v2688_v41  ;;  %2078 = vmatprep.subr.mxu0 %v2542_v26 }
  0x6c   :  { %2065 = vmatpush3.msra.mxu1 %v2688_v41  ;;  %2066 = vmatprep.mubr.f32.mxu1 %v3341_v29 }
  0x6d   :  { %2079 = vmatpush3.msra.mxu0 %v2542_v26  ;;  %2067 = vmatmul.mubr.f32.vlgmr.msra.gmra.mxu1 %v3342_v43 }
  0x6e   :  { %2080 = vmatprep.subr.mxu0 %v2547_v28  ;;  %2110 = vmatprep.subr.mxu1 %v2497_v3 }
  0x6f   :  { %2081 = vmatpush3.msra.mxu0 %v2547_v28  ;;  %2111 = vmatpush3.msra.mxu1 %v2497_v3 }
  0x70   :  { %2082 = vmatprep.subr.mxu0 %v2573_v39  ;;  %2112 = vmatprep.subr.mxu1 %v2499_v4 }
  0x71   :  { %2069 = vmatprep.mubr.f32.mxu1 %v3343_v46  ;;  %2083 = vmatpush3.msra.mxu0 %v2573_v39 }
  0x72   :  { %2113 = vmatpush3.msra.mxu1 %v2499_v4  ;;  %2084 = vmatprep.subr.mxu0 %v2579_v42 }
  0x73   :  { %2070 = vmatmul.mubr.f32.gmra.mxu1 %v179_v19  ;;  %2114 = vmatprep.subr.mxu1 %v2501_v5  ;;  %v3344_v19 = vld [vmem:[#allocation19_spill] sm:$0xff] }
  0x74   :  { %2085 = vmatpush3.msra.mxu0 %v2579_v42  ;;  %2115 = vmatpush3.msra.mxu1 %v2501_v5 }
  0x75   :  { %2086 = vmatprep.subr.mxu0 %v2606_v52  ;;  %2116 = vmatprep.subr.mxu1 %v2503_v9 }
  0x76   :  { %2087 = vmatpush3.msra.mxu0 %v2606_v52  ;;  %2117 = vmatpush3.msra.mxu1 %v2503_v9 }
  0x77   :  { %2088 = vmatprep.subr.mxu0 %v2624_v58  ;;  %2118 = vmatprep.subr.mxu1 %v2505_v10 }
  0x78   :  { %2089 = vmatpush3.msra.mxu0 %v2624_v58  ;;  %2119 = vmatpush3.msra.mxu1 %v2505_v10 }
  0x79   :  { %2090 = vmatprep.subr.mxu0 %v2644_v1  ;;  %2120 = vmatprep.subr.mxu1 %v2507_v11 }
  0x7a   :  { %2091 = vmatpush3.msra.mxu0 %v2644_v1  ;;  %2121 = vmatpush3.msra.mxu1 %v2507_v11 }
  0x7b   :  { %2092 = vmatprep.subr.mxu0 %v2660_v13  ;;  %2122 = vmatprep.subr.mxu1 %v2516_v16 }
  0x7c   :  { %2093 = vmatpush3.msra.mxu0 %v2660_v13  ;;  %2123 = vmatpush3.msra.mxu1 %v2516_v16 }
  0x7d   :  { %2094 = vmatprep.subr.mxu0 %v2684_v40  ;;  %2124 = vmatprep.subr.mxu1 %v2538_v24 }
  0x7e   :  { %2095 = vmatpush3.msra.mxu0 %v2684_v40  ;;  %2125 = vmatpush3.msra.mxu1 %v2538_v24 }
  0x7f   :  { %2096 = vmatprep.subr.mxu0 %v2701_v49  ;;  %2126 = vmatprep.subr.mxu1 %v2544_v27 }
  0x80   :  { %2097 = vmatpush3.msra.mxu0 %v2701_v49  ;;  %2127 = vmatpush3.msra.mxu1 %v2544_v27 }
  0x81   :  { %2098 = vmatprep.subr.mxu0 %v2718_v7  ;;  %2128 = vmatprep.subr.mxu1 %v2563_v34 }
  0x82   :  { %2099 = vmatpush3.msra.mxu0 %v2718_v7  ;;  %2129 = vmatpush3.msra.mxu1 %v2563_v34 }
  0x83   :  { %2100 = vmatprep.subr.mxu0 %v2738_v50  ;;  %2130 = vmatprep.subr.mxu1 %v2588_v45 }
  0x84   :  { %2101 = vmatpush3.msra.mxu0 %v2738_v50  ;;  %2131 = vmatpush3.msra.mxu1 %v2588_v45 }
  0x85   :  { %2102 = vmatprep.subr.mxu0 %v2749_v51  ;;  %2132 = vmatprep.subr.mxu1 %v2595_v47 }
  0x86   :  { %2103 = vmatpush3.msra.mxu0 %v2749_v51  ;;  %2104 = vmatprep.mubr.f32.mxu0 %v2630_v61 }
  0x87   :  { %2133 = vmatpush3.msra.mxu1 %v2595_v47  ;;  %2105 = vmatmul.mubr.f32.vlgmr.msra.gmra.mxu0 %v2635_v62 }
  0x88   :  { %2134 = vmatprep.subr.mxu1 %v2621_v57  ;;  %2107 = vmatprep.mubr.f32.mxu0 %v2794_v18 }
  0x89   :  { %2135 = vmatpush3.msra.mxu1 %v2621_v57  ;;  %2142 = vmatprep.mubr.f32.mxu1 %v2630_v61  ;;  %v3348_v61 = vld [vmem:[#allocation32_spill] sm:$0xff] }
  0x8a   :  { %2136 = vmatprep.subr.mxu1 %v2653_v8  ;;  %2148 = vmatprep.subr.mxu0 %v2497_v3 }
  0x8b   :  { %2137 = vmatpush3.msra.mxu1 %v2653_v8  ;;  %2108 = vmatmul.mubr.f32.gmra.mxu0 %v2799_v0 }
  0x8c   :  { %2138 = vmatprep.subr.mxu1 %v2671_v31  ;;  %2149 = vmatpush3.msra.mxu0 %v2497_v3 }
  0x8d   :  { %2139 = vmatpush3.msra.mxu1 %v2671_v31  ;;  %2150 = vmatprep.subr.mxu0 %v2499_v4 }
  0x8e   :  { %2140 = vmatprep.subr.mxu1 %v2688_v41  ;;  %2151 = vmatpush3.msra.mxu0 %v2499_v4 }
  0x8f   :  { %2141 = vmatpush3.msra.mxu1 %v2688_v41  ;;  %2152 = vmatprep.subr.mxu0 %v2501_v5 }
  0x90   :  { %2143 = vmatmul.mubr.f32.vlgmr.msra.gmra.mxu1 %v2635_v62  ;;  %2186 = vmatprep.subr.mxu1 %v2566_v36  ;;  %v3349_v62 = vld [vmem:[#allocation34_spill] sm:$0xff] }
  0x91   :  { %2145 = vmatprep.mubr.f32.mxu1 %v2794_v18  ;;  %2187 = vmatpush3.msra.mxu1 %v2566_v36  ;;  %v3347_v36 = vld [vmem:[#allocation30_spill] sm:$0xff]  ;;  %v3352_v18 = vld [vmem:[#allocation40_spill] sm:$0xff] }
  0x92   :  { %2188 = vmatprep.subr.mxu1 %v3344_v19  ;;  %2153 = vmatpush3.msra.mxu0 %v2501_v5 }
  0x93   :  { %2189 = vmatpush3.msra.mxu1 %v3344_v19  ;;  %2154 = vmatprep.subr.mxu0 %v2503_v9 }
  0x94   :  { %2146 = vmatmul.mubr.f32.gmra.mxu1 %v2799_v0  ;;  %2190 = vmatprep.subr.mxu1 %v3345_v20 }
  0x95   :  { %2191 = vmatpush3.msra.mxu1 %v3345_v20  ;;  %2155 = vmatpush3.msra.mxu0 %v2503_v9 }
  0x96   :  { %2192 = vmatprep.subr.mxu1 %v3346_v53  ;;  %2156 = vmatprep.subr.mxu0 %v2505_v10 }
  0x97   :  { %2193 = vmatpush3.msra.mxu1 %v3346_v53  ;;  %2157 = vmatpush3.msra.mxu0 %v2505_v10 }
  0x98   :  { %2194 = vmatprep.subr.mxu1 %v3347_v36  ;;  %2158 = vmatprep.subr.mxu0 %v2507_v11 }
  0x99   :  { %2195 = vmatpush3.msra.mxu1 %v3347_v36  ;;  %2159 = vmatpush3.msra.mxu0 %v2507_v11 }
  0x9a   :  { %2196 = vmatprep.subr.mxu1 %v3348_v61  ;;  %2160 = vmatprep.subr.mxu0 %v2516_v16 }
  0x9b   :  { %2197 = vmatpush3.msra.mxu1 %v3348_v61  ;;  %2161 = vmatpush3.msra.mxu0 %v2516_v16 }
  0x9c   :  { %2198 = vmatprep.subr.mxu1 %v3349_v62  ;;  %2162 = vmatprep.subr.mxu0 %v2538_v24 }
  0x9d   :  { %2199 = vmatpush3.msra.mxu1 %v3349_v62  ;;  %2163 = vmatpush3.msra.mxu0 %v2538_v24 }
  0x9e   :  { %2200 = vmatprep.subr.mxu1 %v3350_v25  ;;  %2164 = vmatprep.subr.mxu0 %v2544_v27 }
  0x9f   :  { %2201 = vmatpush3.msra.mxu1 %v3350_v25  ;;  %2165 = vmatpush3.msra.mxu0 %v2544_v27 }
  0xa0   :  { %2202 = vmatprep.subr.mxu1 %v3351_v32  ;;  %2166 = vmatprep.subr.mxu0 %v2563_v34 }
  0xa1   :  { %2203 = vmatpush3.msra.mxu1 %v3351_v32  ;;  %2167 = vmatpush3.msra.mxu0 %v2563_v34 }
  0xa2   :  { %2204 = vmatprep.subr.mxu1 %v3352_v18  ;;  %2168 = vmatprep.subr.mxu0 %v2588_v45 }
  0xa3   :  { %2205 = vmatpush3.msra.mxu1 %v3352_v18  ;;  %2169 = vmatpush3.msra.mxu0 %v2588_v45 }
  0xa4   :  { %2206 = vmatprep.subr.mxu1 %v2725_v2  ;;  %2170 = vmatprep.subr.mxu0 %v2595_v47 }
  0xa5   :  { %2207 = vmatpush3.msra.mxu1 %v2725_v2  ;;  %2171 = vmatpush3.msra.mxu0 %v2595_v47 }
  0xa6   :  { %2208 = vmatprep.subr.mxu1 %v2742_v56  ;;  %2172 = vmatprep.subr.mxu0 %v2621_v57 }
  0xa7   :  { %2209 = vmatpush3.msra.mxu1 %v2742_v56  ;;  %2173 = vmatpush3.msra.mxu0 %v2621_v57 }
  0xa8   :  { %2210 = vmatprep.subr.mxu1 %v2753_v44  ;;  %2174 = vmatprep.subr.mxu0 %v2653_v8 }
  0xa9   :  { %2211 = vmatpush3.msra.mxu1 %v2753_v44  ;;  %2175 = vmatpush3.msra.mxu0 %v2653_v8 }
  0xaa   :  { %2212 = vmatprep.subr.mxu1 %v2763_v37  ;;  %2176 = vmatprep.subr.mxu0 %v2671_v31 }
  0xab   :  { %2213 = vmatpush3.msra.mxu1 %v2763_v37  ;;  %2177 = vmatpush3.msra.mxu0 %v2671_v31 }
  0xac   :  { %2214 = vmatprep.subr.mxu1 %v2769_v63  ;;  %2178 = vmatprep.subr.mxu0 %v2688_v41 }
  0xad   :  { %2215 = vmatpush3.msra.mxu1 %v2769_v63  ;;  %2179 = vmatpush3.msra.mxu0 %v2688_v41 }
  0xae   :  { %2216 = vmatprep.subr.mxu1 %v2775_v35  ;;  %2224 = vmatprep.subr.mxu0 %v2511_v14 }
  0xaf   :  { %2217 = vmatpush3.msra.mxu1 %v2775_v35 }
  0xb0   :  { %2262 = vmatprep.subr.mxu1 %v2497_v3 }
 0x100   :  { %v1954_v44 = vpop.f32.mrf.mxu0 }
 0x102   :  { %v153_v37 = vpop.f32.mrf.mxu0 }
 0x108   :  { %v1992_v0 = vpop.f32.mrf.mxu1 }
 0x109   :  { %v341_v62 = vadd.f32 %v1992_v0, %v1954_v44 }
 0x10a   :  { %v334_v29 = vpop.f32.mrf.mxu1 }
 0x10b   :  { %v335_v32 = vadd.f32 %v334_v29, %v153_v37 }
 0x11d   :  { %v1957_v2 = vpop.f32.mrf.mxu0 }
 0x11f   :  { %v173_v56 = vpop.f32.mrf.mxu0 }
 0x123   :  { %v2030_v55 = vpop.f32.mrf.mxu0 }
 0x124   :  { %v1995_v43 = vpop.f32.mrf.mxu1  ;;  %v464_v18 = vadd.f32 %v2030_v55, %v341_v62 }
 0x125   :  { %v456_v46 = vpop.f32.mrf.mxu0  ;;  %v353_v51 = vadd.f32 %v1995_v43, %v1957_v2 }
 0x126   :  { %v346_v63 = vpop.f32.mrf.mxu1  ;;  %v457_v50 = vadd.f32 %v456_v46, %v335_v32 }
 0x127   :  { %v347_v7 = vadd.f32 %v346_v63, %v173_v56  ;;  %v3353_v56 = vld [vmem:[#allocation29_spill] sm:$0xff] }
 0x129   :  { %v2033_v19 = vpop.f32.mrf.mxu0 }
 0x12a   :  { %v478_v1 = vadd.f32 %v2033_v19, %v353_v51 }
 0x12b   :  { %v470_v53 = vpop.f32.mrf.mxu0 }
 0x12c   :  { %v471_v39 = vadd.f32 %v470_v53, %v347_v7 }
 0x12d   :  { %v2068_v20 = vpop.f32.mrf.mxu1 }
 0x12e   :  { %v575_v49 = vadd.f32 %v2068_v20, %v464_v18 }
 0x12f   :  { %v566_v36 = vpop.f32.mrf.mxu1 }
 0x130   :  { %v567_v58 = vadd.f32 %v566_v36, %v457_v50 }
 0x133   :  { %v2071_v25 = vpop.f32.mrf.mxu1 }
 0x134   :  { %v591_v28 = vadd.f32 %v2071_v25, %v478_v1  ;;  %v3354_v1 = vld [vmem:[#allocation25_spill] sm:$0xff] }
 0x135   :  { %v582_v40 = vpop.f32.mrf.mxu1 }
 0x136   :  { %v583_v0 = vadd.f32 %v582_v40, %v471_v39 }
 0x147   :  { %v2106_v61 = vpop.f32.mrf.mxu0 }
 0x148   :  { %v716_v52 = vadd.f32 %v2106_v61, %v575_v49 }
 0x149   :  { %v709_v35 = vpop.f32.mrf.mxu0 }
 0x14a   :  { %v710_v26 = vadd.f32 %v709_v35, %v567_v58 }
 0x14b   :  { %v2109_v13 = vpop.f32.mrf.mxu0 }
 0x14c   :  { %v728_v21 = vadd.f32 %v2109_v13, %v591_v28 }
 0x14d   :  { %v721_v22 = vpop.f32.mrf.mxu0 }
 0x14e   :  { %v722_v29 = vadd.f32 %v721_v22, %v583_v0 }
 0x150   :  { %v2144_v42 = vpop.f32.mrf.mxu1 }
 0x151   :  { %v821_v23 = vadd.f32 %v2144_v42, %v716_v52 }
 0x152   :  { %v814_v44 = vpop.f32.mrf.mxu1 }
 0x153   :  { %v837_v37 = vmul.f32 0.03125, %v821_v23  ;;  %v815_v55 = vadd.f32 %v814_v44, %v710_v26 }
 0x154   :  { %v2147_v2 = vpop.f32.mrf.mxu1 }
 0x155   :  { %v3024_v43 = vsub.f32 %v3353_v56, %v837_v37  ;;  %v836_v46 = vmul.f32 0.03125, %v815_v55  ;;  %v833_v51 = vadd.f32 %v2147_v2, %v728_v21  ;;  %v3358_v2 = vld [vmem:[#allocation22_spill] sm:$0xff]  ;;  %v3360_v56 = vld [vmem:[#allocation28_spill] sm:$0xff] }
 0x156   :  { %v826_v50 = vpop.f32.mrf.mxu1 }
 0x157   :  { %v845_v49 = vmul.f32 %v3024_v43, %v3024_v43  ;;  %v3029_v58 = vsub.f32 %v3354_v1, %v836_v46  ;;  %v839_v42 = vmul.f32 0.03125, %v833_v51  ;;  %v827_v52 = vadd.f32 %v826_v50, %v722_v29  ;;  %v3359_v29 = vld [vmem:[#allocation24_spill] sm:$0xff] }
 0x159   :  { %v3031_v39 = vand.u32 4294901760, %v845_v49  ;;  %v844_v23 = vmul.f32 %v3029_v58, %v3029_v58  ;;  %v3036_v22 = vsub.f32 %v2787_v38, %v839_v42  ;;  %v838_v26 = vmul.f32 0.03125, %v827_v52 }
 0x15b   :  { %v3039_v21 = vsub.f32 %v845_v49, %v3031_v39  ;;  %v3041_v28 = vand.u32 4294901760, %v844_v23  ;;  %v847_v7 = vmul.f32 %v3036_v22, %v3036_v22  ;;  %v3046_v13 = vsub.f32 %v2783_v12, %v838_v26 }
 0x15d   :  { %v941_v40 = vand.u32 4294901760, %v3039_v21  ;;  %v930_v63 = vsub.f32 %v844_v23, %v3041_v28  ;;  %v3050_v19 = vand.u32 4294901760, %v847_v7  ;;  %v846_v38 = vmul.f32 %v3046_v13, %v3046_v13  ;;  %2218 = vmatprep.mubr.f32.mxu1 %v3041_v28 }
 0x15e   :  { %2219 = vmatmul.mubr.f32.vlgmr.msra.gmra.mxu1 %v3031_v39 }
 0x15f   :  { %v3057_v20 = vsub.f32 %v847_v7, %v3050_v19  ;;  %v3059_v53 = vand.u32 4294901760, %v846_v38  ;;  %2263 = vmatpush3.msra.mxu1 %v2497_v3  ;;  %v931_v12 = vand.u32 4294901760, %v930_v63  ;;  %v942_v36 = vsub.f32 %v3039_v21, %v941_v40 }
 0x160   :  { %2264 = vmatprep.subr.mxu1 %v2499_v4 }
 0x161   :  { %v3067_v61 = vsub.f32 %v846_v38, %v3059_v53  ;;  %2265 = vmatpush3.msra.mxu1 %v2499_v4  ;;  %2221 = vmatprep.mubr.f32.mxu1 %v3059_v53  ;;  %v932_v62 = vsub.f32 %v930_v63, %v931_v12  ;;  %v961_v25 = vand.u32 4294901760, %v3057_v20  ;;  %v943_v18 = vand.u32 4294901760, %v942_v36 }
 0x162   :  { %2266 = vmatprep.subr.mxu1 %v2501_v5  ;;  %2222 = vmatmul.mubr.f32.gmra.mxu1 %v3050_v19 }
 0x163   :  { %2267 = vmatpush3.msra.mxu1 %v2501_v5  ;;  %2294 = vmatprep.mubr.f32.mxu1 %v931_v12  ;;  %v933_v35 = vand.u32 4294901760, %v932_v62  ;;  %v951_v32 = vand.u32 4294901760, %v3067_v61  ;;  %v962_v0 = vsub.f32 %v3057_v20, %v961_v25 }
 0x164   :  { %2268 = vmatprep.subr.mxu1 %v2503_v9 }
 0x165   :  { %2269 = vmatpush3.msra.mxu1 %v2503_v9  ;;  %2180 = vmatprep.mubr.f32.mxu0 %v933_v35  ;;  %v952_v44 = vsub.f32 %v3067_v61, %v951_v32  ;;  %v963_v55 = vand.u32 4294901760, %v962_v0 }
 0x166   :  { %2270 = vmatprep.subr.mxu1 %v2505_v10  ;;  %2181 = vmatmul.mubr.f32.vlgmr.msra.gmra.mxu0 %v943_v18 }
 0x167   :  { %2225 = vmatpush3.msra.mxu0 %v2511_v14  ;;  %2271 = vmatpush3.msra.mxu1 %v2505_v10  ;;  %v953_v37 = vand.u32 4294901760, %v952_v44  ;;  %v3355_v14 = vld [vmem:[#allocation11_spill] sm:$0xff] }
 0x168   :  { %2226 = vmatprep.subr.mxu0 %v2514_v15  ;;  %2272 = vmatprep.subr.mxu1 %v2507_v11 }
 0x169   :  { %2227 = vmatpush3.msra.mxu0 %v2514_v15  ;;  %2273 = vmatpush3.msra.mxu1 %v2507_v11  ;;  %v3356_v15 = vld [vmem:[#allocation12_spill] sm:$0xff] }
 0x16a   :  { %2183 = vmatprep.mubr.f32.mxu0 %v953_v37  ;;  %2228 = vmatprep.subr.mxu0 %v2519_v17 }
 0x16b   :  { %2274 = vmatprep.subr.mxu1 %v2516_v16  ;;  %2184 = vmatmul.mubr.f32.gmra.mxu0 %v963_v55 }
 0x16c   :  { %2229 = vmatpush3.msra.mxu0 %v2519_v17  ;;  %2275 = vmatpush3.msra.mxu1 %v2516_v16  ;;  %v3357_v17 = vld [vmem:[#allocation18_spill] sm:$0xff] }
 0x16d   :  { %2230 = vmatprep.subr.mxu0 %v3355_v14  ;;  %2256 = vmatprep.mubr.f32.mxu0 %v930_v63 }
 0x16e   :  { %2276 = vmatprep.subr.mxu1 %v2538_v24  ;;  %2231 = vmatpush3.msra.mxu0 %v3355_v14 }
 0x16f   :  { %2277 = vmatpush3.msra.mxu1 %v2538_v24  ;;  %2232 = vmatprep.subr.mxu0 %v3356_v15 }
 0x170   :  { %2278 = vmatprep.subr.mxu1 %v2544_v27  ;;  %2233 = vmatpush3.msra.mxu0 %v3356_v15 }
 0x171   :  { %2279 = vmatpush3.msra.mxu1 %v2544_v27  ;;  %2234 = vmatprep.subr.mxu0 %v3357_v17 }
 0x172   :  { %2280 = vmatprep.subr.mxu1 %v2563_v34  ;;  %2235 = vmatpush3.msra.mxu0 %v3357_v17 }
 0x173   :  { %2281 = vmatpush3.msra.mxu1 %v2563_v34  ;;  %2236 = vmatprep.subr.mxu0 %v2560_v33 }
 0x174   :  { %2282 = vmatprep.subr.mxu1 %v2588_v45  ;;  %2237 = vmatpush3.msra.mxu0 %v2560_v33  ;;  %v3370_v33 = vld [vmem:[#allocation33_spill] sm:$0xff] }
 0x175   :  { %2283 = vmatpush3.msra.mxu1 %v2588_v45  ;;  %2238 = vmatprep.subr.mxu0 %v3358_v2 }
 0x176   :  { %2284 = vmatprep.subr.mxu1 %v2595_v47  ;;  %2239 = vmatpush3.msra.mxu0 %v3358_v2 }
 0x177   :  { %2285 = vmatpush3.msra.mxu1 %v2595_v47  ;;  %2240 = vmatprep.subr.mxu0 %v3359_v29 }
 0x178   :  { %2286 = vmatprep.subr.mxu1 %v2621_v57  ;;  %2241 = vmatpush3.msra.mxu0 %v3359_v29 }
 0x179   :  { %2287 = vmatpush3.msra.mxu1 %v2621_v57  ;;  %2242 = vmatprep.subr.mxu0 %v3360_v56 }
 0x17a   :  { %2288 = vmatprep.subr.mxu1 %v2653_v8  ;;  %2243 = vmatpush3.msra.mxu0 %v3360_v56 }
 0x17b   :  { %2289 = vmatpush3.msra.mxu1 %v2653_v8  ;;  %2244 = vmatprep.subr.mxu0 %v2627_v60 }
 0x17c   :  { %2290 = vmatprep.subr.mxu1 %v2671_v31  ;;  %2245 = vmatpush3.msra.mxu0 %v2627_v60  ;;  %v3376_v60 = vld [vmem:[#allocation43_spill] sm:$0xff] }
 0x17d   :  { %2291 = vmatpush3.msra.mxu1 %v2671_v31  ;;  %2246 = vmatprep.subr.mxu0 %v2647_v6 }
 0x17e   :  { %2292 = vmatprep.subr.mxu1 %v2688_v41  ;;  %2247 = vmatpush3.msra.mxu0 %v2647_v6 }
 0x17f   :  { %2293 = vmatpush3.msra.mxu1 %v2688_v41  ;;  %2248 = vmatprep.subr.mxu0 %v2667_v30 }
 0x180   :  { %2295 = vmatmul.mubr.f32.vlgmr.msra.gmra.mxu1 %v941_v40  ;;  %2338 = vmatprep.subr.mxu1 %v2497_v3 }
 0x181   :  { %2249 = vmatpush3.msra.mxu0 %v2667_v30  ;;  %2297 = vmatprep.mubr.f32.mxu1 %v951_v32 }
 0x182   :  { %2339 = vmatpush3.msra.mxu1 %v2497_v3  ;;  %2250 = vmatprep.subr.mxu0 %v2691_v48  ;;  %v3361_v3 = vld [vmem:[#allocation13_spill] sm:$0xff] }
 0x183   :  { %2340 = vmatprep.subr.mxu1 %v2499_v4  ;;  %2251 = vmatpush3.msra.mxu0 %v2691_v48 }
 0x184   :  { %2341 = vmatpush3.msra.mxu1 %v2499_v4  ;;  %2252 = vmatprep.subr.mxu0 %v2707_v54  ;;  %v3362_v4 = vld [vmem:[#allocation14_spill] sm:$0xff] }
 0x185   :  { %2298 = vmatmul.mubr.f32.gmra.mxu1 %v961_v25  ;;  %2342 = vmatprep.subr.mxu1 %v2501_v5 }
 0x186   :  { %2253 = vmatpush3.msra.mxu0 %v2707_v54  ;;  %2343 = vmatpush3.msra.mxu1 %v2501_v5  ;;  %v3363_v5 = vld [vmem:[#allocation15_spill] sm:$0xff]  ;;  %v3374_v54 = vld [vmem:[#allocation41_spill] sm:$0xff] }
 0x187   :  { %2370 = vmatprep.mubr.f32.mxu1 %v3041_v28  ;;  %2254 = vmatprep.subr.mxu0 %v2721_v59 }
 0x188   :  { %2344 = vmatprep.subr.mxu1 %v2503_v9  ;;  %2255 = vmatpush3.msra.mxu0 %v2721_v59 }
 0x189   :  { %2345 = vmatpush3.msra.mxu1 %v2503_v9  ;;  %2257 = vmatmul.mubr.f32.vlgmr.msra.gmra.mxu0 %v3039_v21  ;;  %v3364_v9 = vld [vmem:[#allocation16_spill] sm:$0xff] }
 0x18a   :  { %2300 = vmatprep.subr.mxu0 %v3361_v3  ;;  %2346 = vmatprep.subr.mxu1 %v2505_v10 }
 0x18b   :  { %2259 = vmatprep.mubr.f32.mxu0 %v3067_v61  ;;  %2301 = vmatpush3.msra.mxu0 %v3361_v3 }
 0x18c   :  { %2347 = vmatpush3.msra.mxu1 %v2505_v10  ;;  %2302 = vmatprep.subr.mxu0 %v3362_v4  ;;  %v3365_v10 = vld [vmem:[#allocation17_spill] sm:$0xff] }
 0x18d   :  { %2348 = vmatprep.subr.mxu1 %v2507_v11  ;;  %2303 = vmatpush3.msra.mxu0 %v3362_v4 }
 0x18e   :  { %2349 = vmatpush3.msra.mxu1 %v2507_v11  ;;  %2260 = vmatmul.mubr.f32.gmra.mxu0 %v3057_v20  ;;  %v3366_v11 = vld [vmem:[#allocation20_spill] sm:$0xff] }
 0x18f   :  { %2304 = vmatprep.subr.mxu0 %v3363_v5  ;;  %2350 = vmatprep.subr.mxu1 %v2516_v16 }
 0x190   :  { %2305 = vmatpush3.msra.mxu0 %v3363_v5  ;;  %2332 = vmatprep.mubr.f32.mxu0 %v3041_v28 }
 0x191   :  { %2351 = vmatpush3.msra.mxu1 %v2516_v16  ;;  %2306 = vmatprep.subr.mxu0 %v3364_v9  ;;  %v3367_v16 = vld [vmem:[#allocation21_spill] sm:$0xff] }
 0x192   :  { %2352 = vmatprep.subr.mxu1 %v2538_v24  ;;  %2307 = vmatpush3.msra.mxu0 %v3364_v9 }
 0x193   :  { %2353 = vmatpush3.msra.mxu1 %v2538_v24  ;;  %2308 = vmatprep.subr.mxu0 %v3365_v10  ;;  %v3368_v24 = vld [vmem:[#allocation27_spill] sm:$0xff] }
 0x194   :  { %2354 = vmatprep.subr.mxu1 %v2544_v27  ;;  %2309 = vmatpush3.msra.mxu0 %v3365_v10 }
 0x195   :  { %2355 = vmatpush3.msra.mxu1 %v2544_v27  ;;  %2310 = vmatprep.subr.mxu0 %v3366_v11  ;;  %v3369_v27 = vld [vmem:[#allocation31_spill] sm:$0xff] }
 0x196   :  { %2356 = vmatprep.subr.mxu1 %v2563_v34  ;;  %2311 = vmatpush3.msra.mxu0 %v3366_v11 }
 0x197   :  { %2357 = vmatpush3.msra.mxu1 %v2563_v34  ;;  %2312 = vmatprep.subr.mxu0 %v3367_v16  ;;  %v3371_v34 = vld [vmem:[#allocation35_spill] sm:$0xff] }
 0x198   :  { %2358 = vmatprep.subr.mxu1 %v2588_v45  ;;  %2313 = vmatpush3.msra.mxu0 %v3367_v16 }
 0x199   :  { %2359 = vmatpush3.msra.mxu1 %v2588_v45  ;;  %2314 = vmatprep.subr.mxu0 %v3368_v24  ;;  %v3372_v45 = vld [vmem:[#allocation37_spill] sm:$0xff] }
 0x19a   :  { %2360 = vmatprep.subr.mxu1 %v2595_v47  ;;  %2315 = vmatpush3.msra.mxu0 %v3368_v24 }
 0x19b   :  { %2361 = vmatpush3.msra.mxu1 %v2595_v47  ;;  %2316 = vmatprep.subr.mxu0 %v3369_v27  ;;  %v3373_v47 = vld [vmem:[#allocation39_spill] sm:$0xff] }
 0x19c   :  { %2362 = vmatprep.subr.mxu1 %v2621_v57  ;;  %2317 = vmatpush3.msra.mxu0 %v3369_v27 }
 0x19d   :  { %2363 = vmatpush3.msra.mxu1 %v2621_v57  ;;  %2318 = vmatprep.subr.mxu0 %v3370_v33  ;;  %v3375_v57 = vld [vmem:[#allocation42_spill] sm:$0xff] }
 0x19e   :  { %2364 = vmatprep.subr.mxu1 %v2653_v8  ;;  %2319 = vmatpush3.msra.mxu0 %v3370_v33  ;;  %v1678_v33 = vld [vmem:[%s3237_s1] ss:$0 sm:$0xff]  ;;  %s2459_s1 = smov [#allocation7]  }
 0x19f   :  { %2365 = vmatpush3.msra.mxu1 %v2653_v8  ;;  %2320 = vmatprep.subr.mxu0 %v3371_v34  ;;  %s1665_s29 = sshll.u32 %s2459_s1, 4  ;;  %s1666_s29 = int_to_ptr.vmem [resolvable:$true] %s1665_s29 }
 0x1a0   :  { %2366 = vmatprep.subr.mxu1 %v2671_v31  ;;  %2321 = vmatpush3.msra.mxu0 %v3371_v34  ;;  %p2434_p11 = scmp.lt.s32.totalorder %s1666_s29, %s1666_s29 }
 0x1a1   :  { %2367 = vmatpush3.msra.mxu1 %v2671_v31  ;;  %2322 = vmatprep.subr.mxu0 %v3372_v45 }
 0x1a2   :  { %2368 = vmatprep.subr.mxu1 %v2688_v41  ;;  %2323 = vmatpush3.msra.mxu0 %v3372_v45 }
 0x1a3   :  { %2369 = vmatpush3.msra.mxu1 %v2688_v41  ;;  %2324 = vmatprep.subr.mxu0 %v3373_v47 }
 0x1a4   :  { %2371 = vmatmul.mubr.f32.vlgmr.msra.gmra.mxu1 %v3031_v39  ;;  %2325 = vmatpush3.msra.mxu0 %v3373_v47  ;;  %v1679_v47 = vld [vmem:[%s3238_s2] ss:$0 sm:$0xff]  ;;  %s2429_s2 = scalar_lea.vmem %s1666_s29, 512 }
 0x1a5   :  { %2373 = vmatprep.mubr.f32.mxu1 %v3059_v53  ;;  %2326 = vmatprep.subr.mxu0 %v3374_v54  ;;  %p2430_p10 = scmp.ne.s32.totalorder %s1666_s29, %s2429_s2  ;;  %p2435_p12 = scmp.lt.s32.totalorder %s2429_s2, %s2429_s2 }
 0x1a6   :  { %2327 = vmatpush3.msra.mxu0 %v3374_v54 }
 0x1a7   :  { %2328 = vmatprep.subr.mxu0 %v3375_v57  ;;  %p2436_p13 = por %p2435_p12, %p2434_p11 }
 0x1a8   :  { %2374 = vmatmul.mubr.f32.gmra.mxu1 %v3050_v19  ;;  %2329 = vmatpush3.msra.mxu0 %v3375_v57 }
 0x1a9   :  { %2330 = vmatprep.subr.mxu0 %v3376_v60  ;;  %p2437_p0 = pnand %p2436_p13, %p2430_p10 }
 0x1aa   :  { %2331 = vmatpush3.msra.mxu0 %v3376_v60 }
 0x1ab   :  { %2333 = vmatmul.mubr.f32.vlgmr.msra.gmra.mxu0 %v3031_v39 }
 0x1ac   :  { %2335 = vmatprep.mubr.f32.mxu0 %v3059_v53 }
 0x1af   :  { %2336 = vmatmul.mubr.f32.gmra.mxu0 %v3050_v19 }
 0x21e   :  { %v2220_v6 = vpop.f32.mrf.mxu1 }
 0x220   :  { %v1116_v8 = vpop.f32.mrf.mxu1 }
 0x222   :  { %v2223_v31 = vpop.f32.mrf.mxu1 }
 0x224   :  { %v1128_v48 = vpop.f32.mrf.mxu1 }
 0x226   :  { %v2182_v30 = vpop.f32.mrf.mxu0 }
 0x227   :  { %v1123_v52 = vadd.f32 %v2220_v6, %v2182_v30 }
 0x228   :  { %v935_v41 = vpop.f32.mrf.mxu0 }
 0x229   :  { %v1117_v26 = vadd.f32 %v1116_v8, %v935_v41 }
 0x22b   :  { %v2185_v59 = vpop.f32.mrf.mxu0 }
 0x22c   :  { %v1135_v7 = vadd.f32 %v2223_v31, %v2185_v59 }
 0x22d   :  { %v955_v51 = vpop.f32.mrf.mxu0 }
 0x22e   :  { %v1129_v19 = vadd.f32 %v1128_v48, %v955_v51 }
 0x240   :  { %v2296_v46 = vpop.f32.mrf.mxu1 }
 0x242   :  { %v1348_v50 = vpop.f32.mrf.mxu1 }
 0x245   :  { %v2299_v1 = vpop.f32.mrf.mxu1 }
 0x247   :  { %v1364_v23 = vpop.f32.mrf.mxu1 }
 0x249   :  { %v2258_v49 = vpop.f32.mrf.mxu0 }
 0x24a   :  { %v1246_v21 = vadd.f32 %v2258_v49, %v1123_v52 }
 0x24b   :  { %v1238_v42 = vpop.f32.mrf.mxu0 }
 0x24c   :  { %v1239_v40 = vadd.f32 %v1238_v42, %v1117_v26  ;;  %v1357_v20 = vadd.f32 %v2296_v46, %v1246_v21 }
 0x24e   :  { %v2261_v39 = vpop.f32.mrf.mxu0  ;;  %v1349_v62 = vadd.f32 %v1348_v50, %v1239_v40 }
 0x24f   :  { %v1260_v38 = vadd.f32 %v2261_v39, %v1135_v7 }
 0x250   :  { %v1252_v63 = vpop.f32.mrf.mxu0 }
 0x251   :  { %v1253_v36 = vadd.f32 %v1252_v63, %v1129_v19  ;;  %v1373_v18 = vadd.f32 %v2299_v1, %v1260_v38 }
 0x253   :  { %v1365_v15 = vadd.f32 %v1364_v23, %v1253_v36 }
 0x264   :  { %v2372_v28 = vpop.f32.mrf.mxu1 }
 0x266   :  { %v1596_v53 = vpop.f32.mrf.mxu1 }
 0x268   :  { %v2375_v44 = vpop.f32.mrf.mxu1 }
 0x26a   :  { %v1608_v4 = vpop.f32.mrf.mxu1 }
 0x26b   :  { %v2334_v12 = vpop.f32.mrf.mxu0 }
 0x26c   :  { %v1498_v61 = vadd.f32 %v2334_v12, %v1357_v20 }
 0x26d   :  { %v1491_v25 = vpop.f32.mrf.mxu0 }
 0x26e   :  { %v1603_v35 = vadd.f32 %v2372_v28, %v1498_v61  ;;  %v1492_v32 = vadd.f32 %v1491_v25, %v1349_v62 }
 0x26f   :  { %v2337_v0 = vpop.f32.mrf.mxu0 }
 0x270   :  { %v1619_v37 = vmul.f32 0.03125, %v1603_v35  ;;  %v1597_v55 = vadd.f32 %v1596_v53, %v1492_v32  ;;  %v1510_v14 = vadd.f32 %v2337_v0, %v1373_v18 }
 0x271   :  { %v1503_v17 = vpop.f32.mrf.mxu0 }
 0x272   :  { %v1623_v2 = vadd.f32 1e-05, %v1619_v37  ;;  %v1618_v29 = vmul.f32 0.03125, %v1597_v55  ;;  %v1615_v56 = vadd.f32 %v2375_v44, %v1510_v14  ;;  %v1504_v3 = vadd.f32 %v1503_v17, %v1365_v15 }
 0x274   :  { %2381 = vrsqrt.f32 %v1623_v2  ;;  %v1622_v5 = vadd.f32 1e-05, %v1618_v29  ;;  %v1621_v9 = vmul.f32 0.03125, %v1615_v56  ;;  %v1609_v10 = vadd.f32 %v1608_v4, %v1504_v3 }
 0x276   :  { %2383 = vrsqrt.f32 %v1622_v5  ;;  %v1625_v11 = vadd.f32 1e-05, %v1621_v9  ;;  %v1620_v16 = vmul.f32 0.03125, %v1609_v10 }
 0x278   :  { %2385 = vrsqrt.f32 %v1625_v11  ;;  %v1624_v24 = vadd.f32 1e-05, %v1620_v16 }
 0x27a   :  { %2387 = vrsqrt.f32 %v1624_v24 }
 0x281   :  { %v2382_v27 = vpop.eup %2381 }
 0x282   :  { %v1631_v34 = vmul.f32 %v2382_v27, %v3024_v43 }
 0x283   :  { %v2384_v45 = vpop.eup %2383 }
 0x284   :  { %v1630_v54 = vmul.f32 %v2384_v45, %v3029_v58  ;;  %v1642_v57 = vmul.f32 %v1678_v33, %v1631_v34 }
 0x285   :  { %v2386_v60 = vpop.eup %2385 }
 0x286   :  { %v1633_v6 = vmul.f32 %v2386_v60, %v3036_v22  ;;  %v1641_v8 = vmul.f32 %v1678_v33, %v1630_v54  ;;  %v1653_v30 = vadd.f32 %v1679_v47, %v1642_v57 }
 0x287   :  { %v2388_v31 = vpop.eup %2387 }
 0x288   :  { %v1632_v41 = vmul.f32 %v2388_v31, %v3046_v13  ;;  %v1644_v48 = vmul.f32 %v1678_v33, %v1633_v6  ;;  %v1652_v59 = vadd.f32 %v1679_v47, %v1641_v8  ;;  %1657 = vst [vmem:[#allocation7 + $0x8] sm:$0xff] %v1653_v30 }
 0x28a   :  { %v1643_v43 = vmul.f32 %v1678_v33, %v1632_v41  ;;  %v1655_v46 = vadd.f32 %v1679_v47, %v1644_v48  ;;  %1656 = vst [vmem:[#allocation7] sm:$0xff] %v1652_v59 }
 0x28c   :  { %v1654_v51 = vadd.f32 %v1679_v47, %v1643_v43  ;;  %1659 = vst [vmem:[#allocation7 + $0x18] sm:$0xff] %v1655_v46 }
 0x28e   :  { %1658 = vst [vmem:[#allocation7 + $0x10] sm:$0xff] %v1654_v51 }
 0x28f   :  { %2440 = shalt.err (!%p2437_p0)
}
 0x290   :  { %1671 = dma.vmem_to_hbm [thread:$0]  %s1666_s29, 512, %s3240_s4, [#allocation4], %s2456_s18, %s2456_s18, %s2457_s19  }
 0x291   :  { %2453 = dma.done.wait [#allocation4], 512  }
 0x292   :  { %2454 = vsyncadd [#allocation4], 4294966784 }
 0x293   :  { %1675 = vsyncpa [#allocation3], 1 }
 0x294   :  { %1676 = vsyncpa [#allocation6], 1 }
 0x295   :  { %1677 = vsyncpa [#allocation4], 1 }

</bundles_post_ra>
